<compile_context>
chip_gen: v7x
topology: tpu7x:2x2x1
jax: 0.10.0
libtpu: 0.0.40
codegen_flags: <defaults>
</compile_context>

<pallas_src>
import functools

import jax
import jax.numpy as jnp
from jax.experimental import pallas as pl
from jax.experimental.pallas import tpu as pltpu


# ---------------------------------------------------------------------------
# helpers
# ---------------------------------------------------------------------------
def _round_up(x, m):
    return ((x + m - 1) // m) * m


def _pad_to(arr, shape, dtype):
    """Zero-pad `arr` up to `shape` and cast to `dtype`."""
    out = jnp.zeros(shape, dtype)
    return out.at[tuple(slice(0, s) for s in arr.shape)].set(arr.astype(dtype))


def _choose_tile_m(npad, bytes_per_elem=2, budget_bytes=6 << 20):
    """Largest row tile (multiple of 128, dividing npad) whose double-buffered
    A_r stream (2 * TM * npad * dtype) stays within `budget_bytes`."""
    for cand in (512, 256, 128):
        if npad % cand == 0 and 2 * cand * npad * bytes_per_elem <= budget_bytes:
            return cand
    return 128


# ---------------------------------------------------------------------------
# kernel
# ---------------------------------------------------------------------------
def _rgcn_kernel(x_full_ref, x_rows_ref, a_ref, w_ref, root_ref, bias_ref,
                 o_ref, acc_ref, *, apply_relu):
    """One (row-tile, relation) grid step of an RGCN layer.

    x_full_ref : [Npad, Cin_p]   bf16  (all source nodes, resident)
    x_rows_ref : [TM,   Cin_p]   bf16  (this destination row tile, for the root term)
    a_ref      : [TM,   Npad]    bf16  (row-normalized adjacency of relation r)
    w_ref      : [Cin_p, Cout_p] bf16
    root_ref   : [Cin_p, Cout_p] bf16
    bias_ref   : [1,    Cout_p]  f32
    o_ref      : [TM,   Cout_p]  f32   (written once, at the last relation)
    acc_ref    : [TM,   Cout_p]  f32   VMEM scratch accumulator
    """
    r = pl.program_id(1)

    # Initialize the accumulator with the root transform + bias at the first
    # relation of this row tile.
    @pl.when(r == 0)
    def _():
        acc_ref[...] = (
            jnp.dot(x_rows_ref[...], root_ref[...],
                    preferred_element_type=jnp.float32)
            + bias_ref[...]
        )

    # Per-relation message passing: (A_r[tile] @ x) @ W_r, accumulated in f32.
    agg = jnp.dot(a_ref[...], x_full_ref[...],
                  preferred_element_type=jnp.float32)            # [TM, Cin_p]
    acc_ref[...] += jnp.dot(agg.astype(w_ref.dtype), w_ref[...],
                            preferred_element_type=jnp.float32)  # [TM, Cout_p]

    # Single lane-dense writeback (fused ReLU) at the last relation.
    @pl.when(r == pl.num_programs(1) - 1)
    def _():
        result = acc_ref[...]
        if apply_relu:
            result = jnp.maximum(result, 0.0)
        o_ref[...] = result.astype(o_ref.dtype)


# ---------------------------------------------------------------------------
# layer wrapper
# ---------------------------------------------------------------------------
def rgcn_layer(x, adj_p, weight, root, bias, *, apply_relu):
    """One RGCNConv layer via pallas_call.

    x:      [N, Cin]          float32
    adj_p:  [R, Npad, Npad]   bfloat16 (row-normalized per relation, dst x src,
                              zero-padded to Npad which is a multiple of 128)
    weight: [R, Cin, Cout]    float32
    root:   [Cin, Cout]       float32
    bias:   [1, Cout]         float32
    returns [N, Cout]         float32
    """
    N, Cin = x.shape
    R, npad, _ = adj_p.shape
    Cout = weight.shape[-1]

    if R == 0:  # no relations: root transform + bias only
        return x @ root + bias

    cin_p = _round_up(Cin, 128)
    cout_p = _round_up(Cout, 128)
    tile_m = _choose_tile_m(npad)
    n_row_tiles = npad // tile_m

    # Pad & cast operands (bf16 stream, f32 accumulation inside the kernel).
    xp = _pad_to(x, (npad, cin_p), jnp.bfloat16)
    wp = _pad_to(weight, (R, cin_p, cout_p), jnp.bfloat16)
    rootp = _pad_to(root, (cin_p, cout_p), jnp.bfloat16)
    biasp = _pad_to(bias, (1, cout_p), jnp.float32)

    # VMEM budget estimate (double-buffered inputs/outputs + scratch) with headroom.
    bf16, f32 = 2, 4
    est = (
        2 * npad * cin_p * bf16        # x (full, resident)
        + 2 * tile_m * cin_p * bf16    # x row tile
        + 2 * tile_m * npad * bf16     # A_r row tile
        + 2 * cin_p * cout_p * bf16    # W_r
        + 2 * cin_p * cout_p * bf16    # root
        + 2 * cout_p * f32             # bias
        + 2 * tile_m * cout_p * f32    # output
        + tile_m * cout_p * f32        # accumulator scratch
    )
    vmem_limit = min(max(int(1.5 * est) + (2 << 20), 16 << 20), 64 << 20)

    kernel = functools.partial(_rgcn_kernel, apply_relu=apply_relu)

    out = pl.pallas_call(
        kernel,
        out_shape=jax.ShapeDtypeStruct((npad, cout_p), jnp.float32),
        grid_spec=pltpu.PrefetchScalarGridSpec(
            num_scalar_prefetch=0,
            grid=(n_row_tiles, R),
            in_specs=[
                # x, all source rows (resident across the whole grid)
                pl.BlockSpec((npad, cin_p), lambda i, r: (0, 0)),
                # x, destination row tile (for the root transform)
                pl.BlockSpec((tile_m, cin_p), lambda i, r: (i, 0)),
                # A_r, destination row tile x all source nodes
                pl.BlockSpec((pl.Squeezed(), tile_m, npad), lambda i, r: (r, i, 0)),
                # W_r
                pl.BlockSpec((pl.Squeezed(), cin_p, cout_p), lambda i, r: (r, 0, 0)),
                # root weight (resident)
                pl.BlockSpec((cin_p, cout_p), lambda i, r: (0, 0)),
                # bias (resident)
                pl.BlockSpec((1, cout_p), lambda i, r: (0, 0)),
            ],
            out_specs=pl.BlockSpec((tile_m, cout_p), lambda i, r: (i, 0)),
            scratch_shapes=[pltpu.VMEM((tile_m, cout_p), jnp.float32)],
        ),
        compiler_params=pltpu.CompilerParams(
            dimension_semantics=("parallel", "arbitrary"),
            vmem_limit_bytes=vmem_limit,
        ),
    )(xp, xp, adj_p, wp, rootp, biasp)

    return out[:N, :Cout]


# ---------------------------------------------------------------------------
# glue (plain JAX): edge list -> dense per-relation mean-normalized adjacency
# ---------------------------------------------------------------------------
def build_normalized_adjacency(edge_index, edge_type, num_nodes, num_relations):
    """A[r, i, j] = 1/deg_r(i) for each edge j->i of relation r (mean aggregation)."""
    src = edge_index[0]
    dst = edge_index[1]
    adj = jnp.zeros((num_relations, num_nodes, num_nodes), jnp.float32)
    adj = adj.at[edge_type, dst, src].add(1.0)
    deg = adj.sum(axis=-1, keepdims=True)
    return adj / jnp.maximum(deg, 1.0)


def init_rgcn_params(key, in_channels, out_channels, num_relations):
    """Deterministic Glorot-uniform init (matches xavier_uniform_ style)."""
    k1, k2 = jax.random.split(key)
    glorot = jax.nn.initializers.glorot_uniform()
    weight = glorot(k1, (num_relations, in_channels, out_channels), jnp.float32)
    root = glorot(k2, (in_channels, out_channels), jnp.float32)
    bias = jnp.zeros((1, out_channels), jnp.float32)
    return weight, root, bias


def rgcn_model_sparse(x, edge_index, edge_type, params, num_relations):
    N = x.shape[0]
    adj = build_normalized_adjacency(edge_index, edge_type, N, num_relations)
    npad = _round_up(max(N, 1), 128)
    adj_p = _pad_to(adj, (num_relations, npad, npad), jnp.bfloat16)

    (w1, r1, b1), (w2, r2, b2) = params
    h = rgcn_layer(x, adj_p, w1, r1, b1, apply_relu=True)    # conv1 + ReLU fused
    out = rgcn_layer(h, adj_p, w2, r2, b2, apply_relu=False)  # conv2
    return out


# ---------------------------------------------------------------------------
# pure-JAX reference (mirrors the kernel's bf16 stream / f32 accumulation)
# ---------------------------------------------------------------------------
def rgcn_model_reference(x, edge_index, edge_type, params, num_relations):
    N = x.shape[0]
    adj = build_normalized_adjacency(edge_index, edge_type, N, num_relations)
    a = adj.astype(jnp.bfloat16)

    def layer(h, w, root, bias):
        hb = h.astype(jnp.bfloat16)
        out = jnp.dot(hb, root.astype(jnp.bfloat16),
                      preferred_element_type=jnp.float32) + bias
        agg = jnp.einsum("rnm,mc->rnc", a, hb,
                         preferred_element_type=jnp.float32)
        out = out + jnp.einsum("rnc,rcd->nd", agg.astype(jnp.bfloat16),
                               w.astype(jnp.bfloat16),
                               preferred_element_type=jnp.float32)
        return out

    (w1, r1, b1), (w2, r2, b2) = params
    h = jax.nn.relu(layer(x, w1, r1, b1))
    return layer(h, w2, r2, b2)


# ---------------------------------------------------------------------------
# main
# ---------------------------------------------------------------------------
if __name__ == "__main__":
    # Small synthetic graph consistent with the module's forward signature.
    num_nodes = 16
    in_channels = 8
    hidden_channels = 32
    out_channels = 8
    num_relations = 4
    num_edges = 40

    key = jax.random.PRNGKey(0)
    kx, ke_src, ke_dst, ke_typ, kp1, kp2 = jax.random.split(key, 6)

    x = jax.random.normal(kx, (num_nodes, in_channels), jnp.float32)
    edge_index = jnp.stack(
        [
            jax.random.randint(ke_src, (num_edges,), 0, num_nodes),
            jax.random.randint(ke_dst, (num_edges,), 0, num_nodes),
        ]
    )
    edge_type = jax.random.randint(ke_typ, (num_edges,), 0, num_relations)

    params = (
        init_rgcn_params(kp1, in_channels, hidden_channels, num_relations),
        init_rgcn_params(kp2, hidden_channels, out_channels, num_relations),
    )

    out = rgcn_model_sparse(x, edge_index, edge_type, params, num_relations)
    out = jax.block_until_ready(out)

    ref = rgcn_model_reference(x, edge_index, edge_type, params, num_relations)
    assert out.shape == (num_nodes, out_channels)
    assert jnp.allclose(out, ref, rtol=1e-2, atol=1e-2), (
        float(jnp.max(jnp.abs(out - ref))))

    print("KERNEL_OK")
</pallas_src>

<mosaic_0001>
module attributes {stable_mosaic.version = 11 : i64} {
  func.func @_rgcn_kernel(%arg0: i32, %arg1: i32, %arg2: memref<128x128xbf16, #tpu.memory_space<vmem>>, %arg3: memref<128x128xbf16, #tpu.memory_space<vmem>>, %arg4: memref<1x128x128xbf16, #tpu.memory_space<vmem>>, %arg5: memref<1x128x128xbf16, #tpu.memory_space<vmem>>, %arg6: memref<128x128xbf16, #tpu.memory_space<vmem>>, %arg7: memref<1x128xf32, #tpu.memory_space<vmem>>, %arg8: memref<128x128xf32, #tpu.memory_space<vmem>>, %arg9: memref<128x128xf32, #tpu.memory_space<vmem>>) attributes {dimension_semantics = [#tpu.dimension_semantics<parallel>, #tpu.dimension_semantics<arbitrary>], iteration_bounds = array<i64: 1, 4>, scalar_prefetch = 0 : i64, scratch_operands = 1 : i64, tpu.core_type = #tpu.core_type<tc>, window_params = [{pipeline_mode = #tpu.pipeline_mode<synchronous>, transform_indices = @transform_0, window_bounds = array<i64: 128, 128>}, {transform_indices = @transform_1, window_bounds = array<i64: 128, 128>}, {transform_indices = @transform_2, window_bounds = array<i64: 1, 128, 128>}, {transform_indices = @transform_3, window_bounds = array<i64: 1, 128, 128>}, {pipeline_mode = #tpu.pipeline_mode<synchronous>, transform_indices = @transform_4, window_bounds = array<i64: 128, 128>}, {pipeline_mode = #tpu.pipeline_mode<synchronous>, transform_indices = @transform_5, window_bounds = array<i64: 1, 128>}, {transform_indices = @transform_6, window_bounds = array<i64: 128, 128>}]} {
    %c0_i32 = arith.constant 0 : i32
    %0 = arith.cmpi eq, %arg1, %c0_i32 : i32
    %1 = arith.extui %0 : i1 to i32
    %c0_i32_0 = arith.constant 0 : i32
    %2 = arith.cmpi ne, %1, %c0_i32_0 : i32
    scf.if %2 {
      %c0_14 = arith.constant 0 : index
      %c0_15 = arith.constant 0 : index
      %17 = vector.load %arg3[%c0_14, %c0_15] : memref<128x128xbf16, #tpu.memory_space<vmem>>, vector<128x128xbf16>
      %c0_16 = arith.constant 0 : index
      %c0_17 = arith.constant 0 : index
      %18 = vector.load %arg6[%c0_16, %c0_17] : memref<128x128xbf16, #tpu.memory_space<vmem>>, vector<128x128xbf16>
      %cst_18 = arith.constant dense<0.000000e+00> : vector<128x128xf32>
      %19 = tpu.matmul %17, %18, %cst_18 {dimension_numbers = #tpu.dot_dimension_numbers<[1], [0], [0], [1], [0, 0, 1, 1], [], []>} : vector<128x128xbf16>, vector<128x128xbf16>, vector<128x128xf32> -> vector<128x128xf32>
      %c0_19 = arith.constant 0 : index
      %c0_20 = arith.constant 0 : index
      %20 = vector.load %arg7[%c0_19, %c0_20] : memref<1x128xf32, #tpu.memory_space<vmem>>, vector<1x128xf32>
      %21 = vector.broadcast %20 : vector<1x128xf32> to vector<128x128xf32>
      %22 = arith.addf %19, %21 : vector<128x128xf32>
      %c0_21 = arith.constant 0 : index
      %c0_22 = arith.constant 0 : index
      %23 = vector.load %arg9[%c0_21, %c0_22] : memref<128x128xf32, #tpu.memory_space<vmem>>, vector<128x128xf32>
      tpu.vector_store %arg9[%c0_21, %c0_22], %22 {strides = array<i32>} : memref<128x128xf32, #tpu.memory_space<vmem>>, vector<128x128xf32>,
    } else {
    }
    %c0 = arith.constant 0 : index
    %c0_1 = arith.constant 0 : index
    %c0_2 = arith.constant 0 : index
    %3 = vector.load %arg4[%c0, %c0_1, %c0_2] : memref<1x128x128xbf16, #tpu.memory_space<vmem>>, vector<1x128x128xbf16>
    %4 = vector.shape_cast %3 : vector<1x128x128xbf16> to vector<128x128xbf16>
    %c0_3 = arith.constant 0 : index
    %c0_4 = arith.constant 0 : index
    %5 = vector.load %arg2[%c0_3, %c0_4] : memref<128x128xbf16, #tpu.memory_space<vmem>>, vector<128x128xbf16>
    %cst = arith.constant dense<0.000000e+00> : vector<128x128xf32>
    %6 = tpu.matmul %4, %5, %cst {dimension_numbers = #tpu.dot_dimension_numbers<[1], [0], [0], [1], [0, 0, 1, 1], [], []>} : vector<128x128xbf16>, vector<128x128xbf16>, vector<128x128xf32> -> vector<128x128xf32>
    %c0_5 = arith.constant 0 : index
    %c0_6 = arith.constant 0 : index
    %7 = vector.load %arg9[%c0_5, %c0_6] : memref<128x128xf32, #tpu.memory_space<vmem>>, vector<128x128xf32>
    %8 = arith.truncf %6 : vector<128x128xf32> to vector<128x128xbf16>
    %c0_7 = arith.constant 0 : index
    %c0_8 = arith.constant 0 : index
    %c0_9 = arith.constant 0 : index
    %9 = vector.load %arg5[%c0_7, %c0_8, %c0_9] : memref<1x128x128xbf16, #tpu.memory_space<vmem>>, vector<1x128x128xbf16>
    %10 = vector.shape_cast %9 : vector<1x128x128xbf16> to vector<128x128xbf16>
    %cst_10 = arith.constant dense<0.000000e+00> : vector<128x128xf32>
    %11 = tpu.matmul %8, %10, %cst_10 {dimension_numbers = #tpu.dot_dimension_numbers<[1], [0], [0], [1], [0, 0, 1, 1], [], []>} : vector<128x128xbf16>, vector<128x128xbf16>, vector<128x128xf32> -> vector<128x128xf32>
    %12 = arith.addf %7, %11 : vector<128x128xf32>
    %c0_11 = arith.constant 0 : index
    %c0_12 = arith.constant 0 : index
    %13 = vector.load %arg9[%c0_11, %c0_12] : memref<128x128xf32, #tpu.memory_space<vmem>>, vector<128x128xf32>
    tpu.vector_store %arg9[%c0_11, %c0_12], %12 {strides = array<i32>} : memref<128x128xf32, #tpu.memory_space<vmem>>, vector<128x128xf32>,
    %c3_i32 = arith.constant 3 : i32
    %14 = arith.cmpi eq, %arg1, %c3_i32 : i32
    %15 = arith.extui %14 : i1 to i32
    %c0_i32_13 = arith.constant 0 : i32
    %16 = arith.cmpi ne, %15, %c0_i32_13 : i32
    scf.if %16 {
      %c0_14 = arith.constant 0 : index
      %c0_15 = arith.constant 0 : index
      %17 = vector.load %arg9[%c0_14, %c0_15] : memref<128x128xf32, #tpu.memory_space<vmem>>, vector<128x128xf32>
      %cst_16 = arith.constant 0.000000e+00 : f32
      %18 = vector.broadcast %cst_16 : f32 to vector<128x128xf32>
      %19 = arith.maximumf %17, %18 : vector<128x128xf32>
      %c0_17 = arith.constant 0 : index
      %c0_18 = arith.constant 0 : index
      %20 = vector.load %arg8[%c0_17, %c0_18] : memref<128x128xf32, #tpu.memory_space<vmem>>, vector<128x128xf32>
      tpu.vector_store %arg8[%c0_17, %c0_18], %19 {strides = array<i32>} : memref<128x128xf32, #tpu.memory_space<vmem>>, vector<128x128xf32>,
    } else {
    }
    return
  }
  func.func @transform_0(%arg0: i32, %arg1: i32) -> (i32, i32) {
    %c0_i32 = arith.constant 0 : i32
    %c0_i32_0 = arith.constant 0 : i32
    %c0_i32_1 = arith.constant 0 : i32
    return %c0_i32, %c0_i32_0 : i32, i32
  }
  func.func @transform_1(%arg0: i32, %arg1: i32) -> (i32, i32) {
    %c0_i32 = arith.constant 0 : i32
    %c0_i32_0 = arith.constant 0 : i32
    return %arg0, %c0_i32 : i32, i32
  }
  func.func @transform_2(%arg0: i32, %arg1: i32) -> (i32, i32, i32) {
    %c0_i32 = arith.constant 0 : i32
    %c0_i32_0 = arith.constant 0 : i32
    return %arg1, %arg0, %c0_i32 : i32, i32, i32
  }
  func.func @transform_3(%arg0: i32, %arg1: i32) -> (i32, i32, i32) {
    %c0_i32 = arith.constant 0 : i32
    %c0_i32_0 = arith.constant 0 : i32
    %c0_i32_1 = arith.constant 0 : i32
    return %arg1, %c0_i32, %c0_i32_0 : i32, i32, i32
  }
  func.func @transform_4(%arg0: i32, %arg1: i32) -> (i32, i32) {
    %c0_i32 = arith.constant 0 : i32
    %c0_i32_0 = arith.constant 0 : i32
    %c0_i32_1 = arith.constant 0 : i32
    return %c0_i32, %c0_i32_0 : i32, i32
  }
  func.func @transform_5(%arg0: i32, %arg1: i32) -> (i32, i32) {
    %c0_i32 = arith.constant 0 : i32
    %c0_i32_0 = arith.constant 0 : i32
    %c0_i32_1 = arith.constant 0 : i32
    return %c0_i32, %c0_i32_0 : i32, i32
  }
  func.func @transform_6(%arg0: i32, %arg1: i32) -> (i32, i32) {
    %c0_i32 = arith.constant 0 : i32
    %c0_i32_0 = arith.constant 0 : i32
    return %arg0, %c0_i32 : i32, i32
  }
}

</mosaic_0001>

<bundles_post_ra>
// kernel: tpu_custom_call.1
= control target key start
LH: loop header
LB: loop body
LE: loop exit
PB: predicated region body
PF: predicated region fallthrough
CT: control target
= control target key end

     0   :  { %s2223_s0 = inlined_call_operand.hbm [shape: bf16[128,128], index: 0, kind: input, shape index: {}]   ;;  %s2224_s1 = inlined_call_operand.hbm [shape: bf16[128,128], index: 1, kind: input, shape index: {}]   ;;  %s2225_s2 = inlined_call_operand.hbm [shape: bf16[4,128,128], index: 2, kind: input, shape index: {}]   ;;  %s2226_s3 = inlined_call_operand.hbm [shape: bf16[4,128,128], index: 3, kind: input, shape index: {}]   ;;  %s2227_s4 = inlined_call_operand.hbm [shape: bf16[128,128], index: 4, kind: input, shape index: {}]   ;;  %s2228_s5 = inlined_call_operand.vmem [shape: f32[1,128], index: 5, kind: input, shape index: {}]   ;;  %s2229_s6 = inlined_call_operand.hbm [shape: f32[128,128], index: 6, kind: output, shape index: {}]  }
   0x1   :  { %2245 = sst [smem:[#allocation20_spill]] %s2223_s0 }
   0x2   :  { %2246 = sst [smem:[#allocation21_spill]] %s2224_s1 }
   0x3   :  { %2247 = sst [smem:[#allocation22_spill]] %s2225_s2 }
   0x4   :  { %2248 = sst [smem:[#allocation23_spill]] %s2228_s5 }
   0x5   :  { %2249 = sst [smem:[#allocation24_spill]] %s2229_s6 }
   0x6   :  { %11 = vsyncpa [#allocation4], 0 }
   0x7   :  { %12 = vsyncpa [#allocation7], 0 }
   0x8   :  { %13 = vsyncpa [#allocation5], 0  ;;  %s1893_s21 = smov 0   ;;  %s1895_s22 = smov 0  }
   0x9   :  { %s1897_s23 = smov 0   ;;  %s1899_s24 = smov 0  }
   0xa   :  { %s1901_s25 = smov 0   ;;  %s1903_s26 = smov 0  }
   0xb LB: > { %2250 = sst [smem:[#allocation17_spill]] %s1838_s24  ;;  %s1922_s27 = sadd.s32 4294967295, %s1846_s26   ;;  %s1846_s26 = sphi %s1903_s26, %s19_s26   ;;  %s1842_s25 = sphi %s1901_s25, %s2288_s25   ;;  %s1838_s24 = sphi %s1899_s24, %s2287_s24   ;;  %s1834_s23 = sphi %s1897_s23, %s2286_s23   ;;  %s1830_s22 = sphi %s1895_s22, %s2285_s22   ;;  %s1826_s21 = sphi %s1893_s21, %s2284_s21  }
   0xc   : > { %2251 = sst [smem:[#allocation18_spill]] %s1846_s26  ;;  %p94_p0 = scmp.ne.s32.totalorder %s1834_s23, %s1830_s22 }
   0xd   : > { %p95_p1 = scmp.eq.s32.totalorder %s1846_s26, 0  ;;  %p100_p2 = scmp.ne.s32.totalorder %s1830_s22, %s1826_s21 }
   0xe   : > { %p2230_p3 = scmp.eq.s32.totalorder %s1922_s27, 0  ;;  %p1242_p5 = scmp.ge.s32.totalorder %s1846_s26, 1 }
   0xf   : > { %p96_p4 = por %p95_p1, %p94_p0  ;;  %p205_p7 = scmp.lt.s32.totalorder %s1846_s26, 5 }
  0x10   : > { %p1933_p6 = por %p2230_p3, %p100_p2  ;;  %s1848_s7 = smov [#allocation3]  }
  0x11   : > { %p1938_p8 = pnand %p1242_p5, %p205_p7  ;;  %s217_s8 = sshll.u32 %s1848_s7, 4  ;;  %s1942_s8 = int_to_ptr.vmem [resolvable:$true] %s217_s8 }
  0x12   : > { %s2252_s29 = scalar_select %p1933_p6, 1, 0 }
  0x13   : > { %s2253_s30 = scalar_select %p1938_p8, 1, 0 }
  0x14   : > { %p1488_p9 = pneg %p1938_p8  ;;  %p1508_p10 = scmp.lt.s32.totalorder %s1846_s26, 4 }
  0x15   : > { %s1849_s11 = smov [#allocation6]   ;;  %s2256_s0 = sld [smem:[#allocation20_spill]] }
  0x16   : > { %p1949_p11 = pnand %p1488_p9, %p2230_p3  ;;  %p1953_p12 = pnand %p1508_p10, %p96_p4 }
  0x17   : > { %s233_s12 = sshll.u32 %s1849_s11, 4  ;;  %s1957_s12 = int_to_ptr.vmem [resolvable:$true] %s233_s12 }
  0x18   : > { %s2254_s9 = scalar_select %p1949_p11, 1, 0 }
  0x19   : > { %p1967_p0 = pneg %p1949_p11 }
  0x1b   : > { %s1610_s15 = scalar_lea.hbm %s2256_s0, 1024 }
  0x1c   : > { %p1611_p13 = scmp.ne.s32.totalorder %s2256_s0, %s1610_s15  ;;  %p1617_p4 = scmp.lt.u32.totalorder %s1610_s15, %s2256_s0 }
  0x1d   : > { %s2257_s18 = scalar_select %p1967_p0, 1, 0 }
  0x1e   : > { %p1613_p1 = pnand %p1967_p0, %p1611_p13 }
  0x20   : > { %p1614_p2 = pneg %p1613_p1 }
  0x22   : > { %p1619_p5 = pnand %p1617_p4, %p1614_p2 }
  0x24   : > { %1622 = shalt.err (!%p1619_p5)
}
  0x25   : > { %s1623_s21 = scalar_lea.vmem %s1942_s8, 1024  ;;  %p1631_p3 = scmp.lt.s32.totalorder %s1942_s8, %s1942_s8 }
  0x26   : > { %p1624_p7 = scmp.ne.s32.totalorder %s1942_s8, %s1623_s21  ;;  %p1632_p6 = scmp.lt.s32.totalorder %s1623_s21, %s1623_s21 }
  0x28   : > { %p1626_p9 = pnand %p1624_p7, %p1967_p0  ;;  %p1633_p13 = por %p1632_p6, %p1631_p3 }
  0x2a   : > { %p1627_p10 = pneg %p1626_p9 }
  0x2c   : > { %p1634_p1 = pnand %p1633_p13, %p1627_p10 }
  0x2e   : > { %1637 = shalt.err (!%p1634_p1)
}
  0x2f   : > { %s2232_s7 = smov 64   ;;  %s2234_s11 = smov 4  }
  0x30   : > { %1491 = dma.hbm_to_vmem [thread:$0]  (!%p1949_p11), %s2256_s0, 1024, %s1942_s8, [#allocation4], %s2232_s7, %s2232_s7, %s2234_s11  }
  0x31   : > { %s2258_s1 = sld [smem:[#allocation21_spill]] }
  0x37   : > { %s1638_s17 = scalar_lea.hbm %s2258_s1, 1024 }
  0x38   : > { %p1639_p3 = scmp.ne.s32.totalorder %s2258_s1, %s1638_s17  ;;  %p1645_p4 = scmp.lt.u32.totalorder %s1638_s17, %s2258_s1 }
  0x3a   : > { %p1641_p6 = pnand %p1639_p3, %p1967_p0 }
  0x3c   : > { %p1642_p2 = pneg %p1641_p6 }
  0x3e   : > { %p1647_p5 = pnand %p1645_p4, %p1642_p2 }
  0x40   : > { %1650 = shalt.err (!%p1647_p5)
}
  0x41   : > { %s1651_s8 = scalar_lea.vmem %s1957_s12, 1024  ;;  %p1659_p13 = scmp.lt.s32.totalorder %s1957_s12, %s1957_s12 }
  0x42   : > { %p1652_p7 = scmp.ne.s32.totalorder %s1957_s12, %s1651_s8  ;;  %p1660_p1 = scmp.lt.s32.totalorder %s1651_s8, %s1651_s8 }
  0x44   : > { %p1654_p9 = pnand %p1652_p7, %p1967_p0  ;;  %p1661_p3 = por %p1660_p1, %p1659_p13 }
  0x46   : > { %p1655_p10 = pneg %p1654_p9 }
  0x48   : > { %p1662_p6 = pnand %p1661_p3, %p1655_p10 }
  0x4a   : > { %1665 = shalt.err (!%p1662_p6)
}
  0x4b   : > { %1494 = dma.hbm_to_vmem [thread:$0]  (!%p1949_p11), %s2258_s1, 1024, %s1957_s12, [#allocation7], %s2232_s7, %s2232_s7, %s2234_s11  }
  0x4c   : > { %s263_s14 = sand.u32 1, %s1846_s26   ;;  %s28_s15 = sadd.s32 1, %s1842_s25 }
  0x4d   : > { %p29_p2 = scmp.ge.s32.totalorder %s28_s15, 4  ;;  %s265_s16 = sand.u32 1, %s1834_s23  }
  0x4e   : > { %s2020_s17 = sshll.u32 %s265_s16, 6  ;;  %s2236_s19 = sshll.u32 %s1842_s25, 10 }
  0x4f   : > { %s2290_s15 = smov (%p29_p2, %s28_s15), 0  ;;  %s2260_s2 = sld [smem:[#allocation22_spill]] }
  0x50   : > { %2259 = sst [smem:[#allocation19_spill]] %s2290_s15  ;;  %s82_s12 = ssub.s32 %s1842_s25, %s2290_s15 }
  0x51   : > { %s267_s28 = scalar_lea.vmem [#allocation8], %s2020_s17  ;;  %p2035_p4 = scmp.eq.s32.totalorder %s82_s12, 0 }
  0x52   : > { %s276_s13 = sshll.u32 %s267_s28, 4  ;;  %s2041_s7 = scalar_lea.sflag [#allocation4], %s263_s14  ;;  %s2039_s13 = int_to_ptr.vmem [resolvable:$true] %s276_s13 }
  0x53   : > { %p2244_p7 = pneg %p1953_p12 }
  0x55   : > { %s2030_s8 = scalar_lea.hbm %s2260_s2, %s2236_s19  ;;  %s1671_s28 = scalar_lea.hbm %s2260_s2, 4096 }
  0x56   : > { %s1666_s11 = scalar_lea.hbm %s2030_s8, 1024  ;;  %p1672_p13 = scmp.lt.u32.totalorder %s2030_s8, %s2260_s2 }
  0x57   : > { %p1667_p5 = scmp.ne.s32.totalorder %s2030_s8, %s1666_s11  ;;  %p1673_p1 = scmp.lt.u32.totalorder %s1671_s28, %s1666_s11 }
  0x58   : > { %p1675_p6 = scmp.lt.u32.totalorder %s1666_s11, %s2030_s8 }
  0x59   : > { %p1669_p9 = pnand %p2244_p7, %p1667_p5  ;;  %p1674_p3 = por %p1673_p1, %p1672_p13 }
  0x5b   : > { %p1670_p10 = pneg %p1669_p9  ;;  %p1676_p2 = por %p1675_p6, %p1674_p3 }
  0x5d   : > { %p1677_p8 = pnand %p1676_p2, %p1670_p10 }
  0x5f   : > { %1680 = shalt.err (!%p1677_p8)
}
  0x60   : > { %s1681_s14 = scalar_lea.vmem %s2039_s13, 1024  ;;  %s1852_s20 = smov [#allocation8]  }
  0x61   : > { %p1682_p5 = scmp.ne.s32.totalorder %s2039_s13, %s1681_s14  ;;  %s1686_s21 = sshll.u32 %s1852_s20, 4  ;;  %s1687_s21 = int_to_ptr.vmem [resolvable:$false] %s1686_s21 }
  0x62   : > { %s1688_s19 = scalar_lea.vmem %s1687_s21, 2048  ;;  %p1689_p0 = scmp.lt.s32.totalorder %s2039_s13, %s1687_s21 }
  0x63   : > { %p1684_p9 = pnand %p1682_p5, %p2244_p7  ;;  %p1690_p13 = scmp.lt.s32.totalorder %s1688_s19, %s1681_s14 }
  0x65   : > { %p1685_p11 = pneg %p1684_p9  ;;  %p1691_p1 = por %p1690_p13, %p1689_p0 }
  0x67   : > { %p1692_p3 = pnand %p1691_p1, %p1685_p11 }
  0x69   : > { %1695 = shalt.err (!%p1692_p3)
}
  0x6a   : > { %s2262_s11 = smov 4   ;;  %s2263_s28 = smov 64  }
  0x6b   : > { %1501 = dma.hbm_to_vmem [thread:$0]  (!%p1953_p12), %s2030_s8, 1024, %s2039_s13, %s2041_s7, %s2263_s28, %s2263_s28, %s2262_s11  }
  0x6c   : > { %s2264_s12 = sadd.s32 1, %s1834_s23  ;;  %s1853_s20 = smov [#allocation10]  }
  0x6d   : > { %s2077_s14 = scalar_select %p2035_p4, %s1834_s23, %s2264_s12  }
  0x6e   : > { %s246_s21 = sshll.u32 %s1853_s20, 4  ;;  %s2265_s19 = sshll.u32 %s1842_s25, 10  ;;  %s247_s21 = int_to_ptr.vmem [resolvable:$true] %s246_s21 }
  0x6f   : > { %s2084_s2 = scalar_lea.hbm %s2226_s3, %s2265_s19  ;;  %s290_s15 = scalar_lea.vmem [#allocation9], %s2020_s17 }
  0x70   : > { %s297_s26 = sshll.u32 %s290_s15, 4  ;;  %s1696_s24 = scalar_lea.hbm %s2227_s4, 1024  ;;  %s2108_s26 = int_to_ptr.vmem [resolvable:$true] %s297_s26 }
  0x71   : > { %p1697_p8 = scmp.ne.s32.totalorder %s2227_s4, %s1696_s24  ;;  %p2266_p11 = scmp.ne.s32.totalorder %s2257_s18, 0 }
  0x72   : > { %p1703_p10 = scmp.lt.u32.totalorder %s1696_s24, %s2227_s4 }
  0x73   : > { %p1699_p0 = pnand %p1697_p8, %p2266_p11 }
  0x75   : > { %p1700_p4 = pneg %p1699_p0 }
  0x77   : > { %p1705_p6 = pnand %p1703_p10, %p1700_p4 }
  0x79   : > { %1708 = shalt.err (!%p1705_p6)
}
  0x7a   : > { %s1709_s0 = scalar_lea.vmem %s247_s21, 1024  ;;  %p1717_p13 = scmp.lt.s32.totalorder %s247_s21, %s247_s21 }
  0x7b   : > { %p1710_p2 = scmp.ne.s32.totalorder %s247_s21, %s1709_s0  ;;  %p1718_p1 = scmp.lt.s32.totalorder %s1709_s0, %s1709_s0 }
  0x7d   : > { %p1712_p5 = pnand %p1710_p2, %p2266_p11  ;;  %p1719_p3 = por %p1718_p1, %p1717_p13 }
  0x7f   : > { %p1713_p9 = pneg %p1712_p5 }
  0x81   : > { %p1720_p7 = pnand %p1719_p3, %p1713_p9 }
  0x83   : > { %1723 = shalt.err (!%p1720_p7)
}
  0x84   : > { %p2267_p8 = scmp.ne.s32.totalorder %s2254_s9, 0  ;;  %s1724_s6 = scalar_lea.hbm %s2084_s2, 1024 }
  0x85   : > { %p1725_p11 = scmp.ne.s32.totalorder %s2084_s2, %s1724_s6  ;;  %p2268_p7 = pneg %p1953_p12 }
  0x86   : > { %1497 = dma.hbm_to_vmem [thread:$0]  (!%p2267_p8), %s2227_s4, 1024, %s247_s21, [#allocation7], %s2263_s28, %s2263_s28, %s2262_s11  }
  0x87   : > { %p1727_p0 = pnand %p1725_p11, %p2268_p7  ;;  %s1729_s18 = scalar_lea.hbm %s2226_s3, 4096 }
  0x88   : > { %p1730_p10 = scmp.lt.u32.totalorder %s2084_s2, %s2226_s3  ;;  %p1731_p6 = scmp.lt.u32.totalorder %s1729_s18, %s1724_s6 }
  0x89   : > { %p1728_p4 = pneg %p1727_p0  ;;  %p1733_p5 = scmp.lt.u32.totalorder %s1724_s6, %s2084_s2 }
  0x8a   : > { %p1732_p2 = por %p1731_p6, %p1730_p10 }
  0x8c   : > { %p1734_p9 = por %p1733_p5, %p1732_p2 }
  0x8e   : > { %p1735_p13 = pnand %p1734_p9, %p1728_p4 }
  0x90   : > { %1738 = shalt.err (!%p1735_p13)
}
  0x91   : > { %s1739_s20 = scalar_lea.vmem %s2108_s26, 1024  ;;  %p2269_p3 = pmov %p2268_p7 }
  0x92   : > { %p1740_p1 = scmp.ne.s32.totalorder %s2108_s26, %s1739_s20  ;;  %s1854_s21 = smov [#allocation9]  }
  0x93   : > { %s1744_s19 = sshll.u32 %s1854_s21, 4  ;;  %s1745_s19 = int_to_ptr.vmem [resolvable:$false] %s1744_s19 }
  0x94   : > { %p1742_p8 = pnand %p1740_p1, %p2269_p3  ;;  %s1746_s8 = scalar_lea.vmem %s1745_s19, 2048 }
  0x95   : > { %p1747_p7 = scmp.lt.s32.totalorder %s2108_s26, %s1745_s19  ;;  %p1748_p0 = scmp.lt.s32.totalorder %s1746_s8, %s1739_s20 }
  0x96   : > { %p1743_p11 = pneg %p1742_p8 }
  0x97   : > { %p1749_p10 = por %p1748_p0, %p1747_p7 }
  0x99   : > { %p1750_p6 = pnand %p1749_p10, %p1743_p11 }
  0x9b   : > { %1753 = shalt.err (!%p1750_p6)
}
  0x9c   : > { %1504 = dma.hbm_to_vmem [thread:$0]  (!%p1953_p12), %s2084_s2, 1024, %s2108_s26, %s2041_s7, %s2263_s28, %s2263_s28, %s2262_s11  }
  0x9d   : > { %p2270_p4 = scmp.ne.s32.totalorder %s2253_s30, 0 }
  0x9e   : > { %p2271_p2 = scmp.eq.s32.totalorder (!%p2270_p4), %s1922_s27, 0 }
  0x9f   : > { %309 = sbr.rel (%p2270_p4) target bundleno = 979 (0x3d3), region = 44 }
  0xa6   : > { %1805 = dma.done.wait (%p2271_p2), [#allocation4], 1024   ;;  %p2272_p5 = pmov %p2271_p2 }
  0xa7   : > { %p2273_p9 = pmov %p2271_p2 }
  0xa8   : > { %1807 = vsyncadd (%p2272_p5), [#allocation4], 4294966272 }
  0xa9   : > { %1809 = dma.done.wait (%p2273_p9), [#allocation7], 1024   ;;  %p2274_p13 = pmov %p2271_p2 }
  0xaa   : > { %s319_s10 = sand.u32 1, %s1922_s27   ;;  %s321_s2 = sand.u32 1, %s1830_s22  }
  0xab   : > { %1811 = vsyncadd (%p2274_p13), [#allocation7], 4294966272  ;;  %s1256_s26 = sshll.u32 %s321_s2, 6  ;;  %s320_s30 = scalar_lea.sflag [#allocation4], %s319_s10 }
  0xac   : > { %s2149_s7 = scalar_lea.vmem [#allocation8], %s1256_s26  ;;  %p2275_p12 = scmp.ne.s32.totalorder %s2252_s29, 0 }
  0xae   : > { %1813 = dma.done.wait (%p2275_p12), %s320_s30, 2048  }
  0xaf   : > { %1815 = vsyncadd (%p2275_p12), %s320_s30, 4294965248  ;;  %s2155_s11 = scalar_lea.vmem [#allocation9], %s1256_s26  ;;  %p2276_p1 = pmov %p2271_p2 }
  0xb1   : > { %1817 = dma.done.wait (%p2276_p1), [#allocation7], 1024   ;;  %p2277_p3 = pmov %p2276_p1 }
  0xb2   : > { %s2278_s28 = sld [smem:[#allocation17_spill]] }
  0xb3   : > { %1819 = vsyncadd (%p2277_p3), [#allocation7], 4294966272 }
  0xb8   : > { %p1259_p8 = scmp.ne.s32.totalorder %s2278_s28, 0 }
  0xb9   : > { %v1570_v0 = vld [vmem:[#allocation10] sm:$0xff] (!%p1259_p8)   ;;  %v1571_v1 = vld [vmem:[#allocation10 + $0x8] sm:$0xff] (!%p1259_p8)   ;;  %v1572_v2 = vld [vmem:[#allocation10 + $0x10] sm:$0xff] (!%p1259_p8)   ;;  %s2279_s16 = sld [smem:[#allocation23_spill]] (!%p1259_p8) }
  0xba   : > { %372 = sbr.rel (%p1259_p8) target bundleno = 444 (0x1bc), region = 68  ;;  %1356 = vmatprep.subr.bf16.mxu0 (!%p1259_p8), %v1570_v0  ;;  %1452 = vmatprep.subr.bf16.mxu1 (!%p1259_p8), %v1570_v0  ;;  %v1573_v3 = vld [vmem:[#allocation10 + $0x18] sm:$0xff] (!%p1259_p8)   ;;  %v1578_v4 = vld [vmem:[#allocation6] sm:$0xff] (!%p1259_p8)   ;;  %v1575_v7 = vld [vmem:[#allocation10 + $0x28] sm:$0xff] (!%p1259_p8)  }
  0xbb   : > { %1357 = vmatpush3.bf16.msra.mxu0 (!%p1259_p8), %v1570_v0  ;;  %1460 = vmatpush3.bf16.msra.mxu1 (!%p1259_p8), %v1570_v0  ;;  %v1579_v5 = vld [vmem:[#allocation6 + $0x20] sm:$0xff] (!%p1259_p8)   ;;  %v1576_v8 = vld [vmem:[#allocation10 + $0x30] sm:$0xff] (!%p1259_p8)   ;;  %v1577_v9 = vld [vmem:[#allocation10 + $0x38] sm:$0xff] (!%p1259_p8)  }
  0xbc   : > { %1358 = vmatprep.subr.bf16.mxu0 (!%p1259_p8), %v1571_v1  ;;  %1453 = vmatprep.subr.bf16.mxu1 (!%p1259_p8), %v1571_v1  ;;  %v1574_v6 = vld [vmem:[#allocation10 + $0x20] sm:$0xff] (!%p1259_p8)   ;;  %v1580_v10 = vld [vmem:[#allocation6 + $0x8] sm:$0xff] (!%p1259_p8)   ;;  %v1582_v12 = vld [vmem:[#allocation6 + $0x10] sm:$0xff] (!%p1259_p8)  }
  0xbd   : > { %1372 = vmatprep.mubr.bf16.mxu0 (!%p1259_p8), %v1578_v4  ;;  %1380 = vmatprep.mubr.bf16.mxu1 (!%p1259_p8), %v1579_v5  ;;  %v1581_v11 = vld [vmem:[#allocation6 + $0x28] sm:$0xff] (!%p1259_p8)   ;;  %v1583_v13 = vld [vmem:[#allocation6 + $0x30] sm:$0xff] (!%p1259_p8)   ;;  %v1584_v14 = vld [vmem:[#allocation6 + $0x18] sm:$0xff] (!%p1259_p8)  }
  0xbe   : > { %v1585_v15 = vld [vmem:[#allocation6 + $0x38] sm:$0xff] (!%p1259_p8)  }
  0xbf   : > { %1359 = vmatpush3.bf16.msra.mxu0 (!%p1259_p8), %v1571_v1  ;;  %1461 = vmatpush3.bf16.msra.mxu1 (!%p1259_p8), %v1571_v1  ;;  %v1260_v16 = vld [vmem:[%s2279_s16] ss:$0 sm:$0xff] (!%p1259_p8) }
  0xc0   : > { %1360 = vmatprep.subr.bf16.mxu0 (!%p1259_p8), %v1572_v2  ;;  %1454 = vmatprep.subr.bf16.mxu1 (!%p1259_p8), %v1572_v2 }
  0xc3   : > { %1361 = vmatpush3.bf16.msra.mxu0 %v1572_v2  ;;  %1462 = vmatpush3.bf16.msra.mxu1 %v1572_v2 }
  0xc4   : > { %1362 = vmatprep.subr.bf16.mxu0 %v1573_v3  ;;  %1455 = vmatprep.subr.bf16.mxu1 %v1573_v3 }
  0xc7   : > { %1363 = vmatpush3.bf16.msra.mxu0 %v1573_v3  ;;  %1463 = vmatpush3.bf16.msra.mxu1 %v1573_v3 }
  0xc8   : > { %1364 = vmatprep.subr.bf16.mxu0 %v1574_v6  ;;  %1456 = vmatprep.subr.bf16.mxu1 %v1574_v6 }
  0xcb   : > { %1365 = vmatpush3.bf16.msra.mxu0 %v1574_v6  ;;  %1464 = vmatpush3.bf16.msra.mxu1 %v1574_v6 }
  0xcc   : > { %1366 = vmatprep.subr.bf16.mxu0 %v1575_v7  ;;  %1457 = vmatprep.subr.bf16.mxu1 %v1575_v7 }
  0xcf   : > { %1367 = vmatpush3.bf16.msra.mxu0 %v1575_v7  ;;  %1465 = vmatpush3.bf16.msra.mxu1 %v1575_v7 }
  0xd0   : > { %1368 = vmatprep.subr.bf16.mxu0 %v1576_v8  ;;  %1458 = vmatprep.subr.bf16.mxu1 %v1576_v8 }
  0xd3   : > { %1369 = vmatpush3.bf16.msra.mxu0 %v1576_v8  ;;  %1466 = vmatpush3.bf16.msra.mxu1 %v1576_v8 }
  0xd4   : > { %1370 = vmatprep.subr.bf16.mxu0 %v1577_v9  ;;  %1459 = vmatprep.subr.bf16.mxu1 %v1577_v9 }
  0xd7   : > { %1371 = vmatpush3.bf16.msra.mxu0 %v1577_v9  ;;  %1467 = vmatpush3.bf16.msra.mxu1 %v1577_v9 }
  0xda   : > { %1373 = vmatmul.mubr.bf16.vlgmr.msra.gmra.mrb[0].mxu0 %v1580_v10  ;;  %1381 = vmatmul.mubr.bf16.vlgmr.msra.gmra.mrb[0].mxu1 %v1581_v11 }
  0xdb   : > { %1376 = vmatprep.mubr.bf16.mxu0 %v1582_v12  ;;  %1384 = vmatprep.mubr.bf16.mxu1 %v1583_v13 }
  0xe2   : > { %1377 = vmatmul.mubr.bf16.gmra.mrb[4].mxu0 %v1584_v14  ;;  %1385 = vmatmul.mubr.bf16.gmra.mrb[4].mxu1 %v1585_v15 }
 0x1ad   : > { %v1374_v17 = vpop.f32.mrb[0].mxu0  ;;  %v1382_v18 = vpop.f32.mrb[0].mxu1 }
 0x1ae   : > { %v551_v19 = vadd.f32 %v1374_v17, %v1260_v16  ;;  %v583_v20 = vadd.f32 %v1382_v18, %v1260_v16  ;;  %v542_v21 = vpop.f32.mrb[1].mxu0  ;;  %v574_v22 = vpop.f32.mrb[1].mxu1 }
 0x1af   : > { %v543_v23 = vadd.f32 %v1260_v16, %v542_v21  ;;  %v575_v24 = vadd.f32 %v1260_v16, %v574_v22  ;;  %v1375_v25 = vpop.f32.mrb[2].mxu0  ;;  %v1383_v26 = vpop.f32.mrb[2].mxu1 }
 0x1b0   : > { %607 = vst [vmem:[#allocation2 + $0x10] sm:$0xff] %v551_v19  ;;  %615 = vst [vmem:[#allocation2 + $0x50] sm:$0xff] %v583_v20  ;;  %v554_v27 = vadd.f32 %v1375_v25, %v1260_v16  ;;  %v586_v28 = vadd.f32 %v1383_v26, %v1260_v16  ;;  %v545_v29 = vpop.f32.mrb[3].mxu0  ;;  %v577_v30 = vpop.f32.mrb[3].mxu1 }
 0x1b1   : > { %605 = vst [vmem:[#allocation2] sm:$0xff] %v543_v23  ;;  %613 = vst [vmem:[#allocation2 + $0x40] sm:$0xff] %v575_v24  ;;  %v546_v31 = vadd.f32 %v1260_v16, %v545_v29  ;;  %v578_v32 = vadd.f32 %v1260_v16, %v577_v30 }
 0x1b2   : > { %608 = vst [vmem:[#allocation2 + $0x18] sm:$0xff] %v554_v27  ;;  %616 = vst [vmem:[#allocation2 + $0x58] sm:$0xff] %v586_v28 }
 0x1b3   : > { %606 = vst [vmem:[#allocation2 + $0x8] sm:$0xff] %v546_v31  ;;  %614 = vst [vmem:[#allocation2 + $0x48] sm:$0xff] %v578_v32 }
 0x1b5   : > { %v1378_v33 = vpop.f32.mrb[4].mxu0  ;;  %v1386_v34 = vpop.f32.mrb[4].mxu1 }
 0x1b6   : > { %v567_v35 = vadd.f32 %v1378_v33, %v1260_v16  ;;  %v599_v36 = vadd.f32 %v1386_v34, %v1260_v16  ;;  %v558_v37 = vpop.f32.mrb[5].mxu0  ;;  %v590_v38 = vpop.f32.mrb[5].mxu1 }
 0x1b7   : > { %v559_v39 = vadd.f32 %v1260_v16, %v558_v37  ;;  %v591_v40 = vadd.f32 %v1260_v16, %v590_v38  ;;  %v1379_v41 = vpop.f32.mrb[6].mxu0  ;;  %v1387_v42 = vpop.f32.mrb[6].mxu1 }
 0x1b8   : > { %611 = vst [vmem:[#allocation2 + $0x30] sm:$0xff] %v567_v35  ;;  %619 = vst [vmem:[#allocation2 + $0x70] sm:$0xff] %v599_v36  ;;  %v570_v43 = vadd.f32 %v1379_v41, %v1260_v16  ;;  %v602_v44 = vadd.f32 %v1387_v42, %v1260_v16  ;;  %v561_v45 = vpop.f32.mrb[7].mxu0  ;;  %v593_v46 = vpop.f32.mrb[7].mxu1 }
 0x1b9   : > { %609 = vst [vmem:[#allocation2 + $0x20] sm:$0xff] %v559_v39  ;;  %617 = vst [vmem:[#allocation2 + $0x60] sm:$0xff] %v591_v40  ;;  %v562_v47 = vadd.f32 %v1260_v16, %v561_v45  ;;  %v594_v48 = vadd.f32 %v1260_v16, %v593_v46 }
 0x1ba   : > { %612 = vst [vmem:[#allocation2 + $0x38] sm:$0xff] %v570_v43  ;;  %620 = vst [vmem:[#allocation2 + $0x78] sm:$0xff] %v602_v44 }
 0x1bb   : > { %610 = vst [vmem:[#allocation2 + $0x28] sm:$0xff] %v562_v47  ;;  %618 = vst [vmem:[#allocation2 + $0x68] sm:$0xff] %v594_v48 }
 0x1bc PF: > { %v1586_v49 = vld [vmem:[#allocation3] sm:$0xff]   ;;  %v1587_v50 = vld [vmem:[#allocation3 + $0x8] sm:$0xff]   ;;  %v1588_v51 = vld [vmem:[#allocation3 + $0x10] sm:$0xff]   ;;  %s2280_s12 = sld [smem:[#allocation17_spill]] }
 0x1bd   : > { %1388 = vmatprep.subr.bf16.mxu0 %v1586_v49  ;;  %v1589_v52 = vld [vmem:[#allocation3 + $0x18] sm:$0xff]   ;;  %v1594_v53 = vld [vmem:[%s2149_s7] sm:$0xff]   ;;  %v1591_v55 = vld [vmem:[#allocation3 + $0x28] sm:$0xff]  }
 0x1be   : > { %1389 = vmatpush3.bf16.msra.mxu0 %v1586_v49  ;;  %1404 = vmatprep.mubr.bf16.mxu0 %v1594_v53  ;;  %v1590_v54 = vld [vmem:[#allocation3 + $0x20] sm:$0xff]   ;;  %v1603_v57 = vld [vmem:[%s2155_s11 + $0x8] sm:$0xff]   ;;  %v1592_v58 = vld [vmem:[#allocation3 + $0x30] sm:$0xff]  }
 0x1bf   : > { %1390 = vmatprep.subr.bf16.mxu0 %v1587_v50  ;;  %v1602_v56 = vld [vmem:[%s2155_s11] sm:$0xff]   ;;  %v1604_v59 = vld [vmem:[%s2155_s11 + $0x10] sm:$0xff]   ;;  %v1593_v60 = vld [vmem:[#allocation3 + $0x38] sm:$0xff]  }
 0x1c0   : > { %1420 = vmatprep.subr.bf16.mxu1 %v1602_v56  ;;  %v1605_v61 = vld [vmem:[%s2155_s11 + $0x18] sm:$0xff]   ;;  %v1606_v62 = vld [vmem:[%s2155_s11 + $0x20] sm:$0xff]   ;;  %v1595_v63 = vld [vmem:[%s2149_s7 + $0x8] sm:$0xff]  }
 0x1c1   : > { %1421 = vmatpush3.bf16.msra.mxu1 %v1602_v56  ;;  %v1596_v0 = vld [vmem:[%s2149_s7 + $0x10] sm:$0xff]   ;;  %v1607_v1 = vld [vmem:[%s2155_s11 + $0x28] sm:$0xff]   ;;  %v1597_v3 = vld [vmem:[%s2149_s7 + $0x18] sm:$0xff]  }
 0x1c2   : > { %1391 = vmatpush3.bf16.msra.mxu0 %v1587_v50  ;;  %1422 = vmatprep.subr.bf16.mxu1 %v1603_v57  ;;  %v1608_v2 = vld [vmem:[%s2155_s11 + $0x30] sm:$0xff]   ;;  %v1598_v4 = vld [vmem:[%s2149_s7 + $0x20] sm:$0xff]   ;;  %v1599_v5 = vld [vmem:[%s2149_s7 + $0x28] sm:$0xff]   ;;  %p1301_p11 = scmp.ne.s32.totalorder %s2280_s12, 3 }
 0x1c3   : > { %1392 = vmatprep.subr.bf16.mxu0 %v1588_v51  ;;  %v1600_v6 = vld [vmem:[%s2149_s7 + $0x30] sm:$0xff]   ;;  %v1601_v7 = vld [vmem:[%s2149_s7 + $0x38] sm:$0xff]   ;;  %v846_v34 = vld [vmem:[#allocation2] sm:$0xff] }
 0x1c4   : > { %v1609_v8 = vld [vmem:[%s2155_s11 + $0x38] sm:$0xff]   ;;  %v848_v33 = vld [vmem:[#allocation2 + $0x10] sm:$0xff]  ;;  %v847_v39 = vld [vmem:[#allocation2 + $0x8] sm:$0xff] }
 0x1c5   : > { %1423 = vmatpush3.bf16.msra.mxu1 %v1603_v57  ;;  %v849_v36 = vld [vmem:[#allocation2 + $0x18] sm:$0xff]  ;;  %v852_v45 = vld [vmem:[#allocation2 + $0x30] sm:$0xff]  ;;  %v850_v46 = vld [vmem:[#allocation2 + $0x20] sm:$0xff] }
 0x1c6   : > { %1393 = vmatpush3.bf16.msra.mxu0 %v1588_v51  ;;  %1424 = vmatprep.subr.bf16.mxu1 %v1604_v59  ;;  %v853_v48 = vld [vmem:[#allocation2 + $0x38] sm:$0xff]  ;;  %v851_v51 = vld [vmem:[#allocation2 + $0x28] sm:$0xff]  ;;  %v856_v57 = vld [vmem:[#allocation2 + $0x50] sm:$0xff] }
 0x1c7   : > { %1394 = vmatprep.subr.bf16.mxu0 %v1589_v52 }
 0x1c9   : > { %1425 = vmatpush3.bf16.msra.mxu1 %v1604_v59 }
 0x1ca   : > { %1395 = vmatpush3.bf16.msra.mxu0 %v1589_v52  ;;  %1426 = vmatprep.subr.bf16.mxu1 %v1605_v61 }
 0x1cb   : > { %1396 = vmatprep.subr.bf16.mxu0 %v1590_v54 }
 0x1cd   : > { %1427 = vmatpush3.bf16.msra.mxu1 %v1605_v61 }
 0x1ce   : > { %1397 = vmatpush3.bf16.msra.mxu0 %v1590_v54  ;;  %1428 = vmatprep.subr.bf16.mxu1 %v1606_v62 }
 0x1cf   : > { %1398 = vmatprep.subr.bf16.mxu0 %v1591_v55 }
 0x1d1   : > { %1429 = vmatpush3.bf16.msra.mxu1 %v1606_v62 }
 0x1d2   : > { %1399 = vmatpush3.bf16.msra.mxu0 %v1591_v55  ;;  %1430 = vmatprep.subr.bf16.mxu1 %v1607_v1 }
 0x1d3   : > { %1400 = vmatprep.subr.bf16.mxu0 %v1592_v58 }
 0x1d5   : > { %1431 = vmatpush3.bf16.msra.mxu1 %v1607_v1 }
 0x1d6   : > { %1401 = vmatpush3.bf16.msra.mxu0 %v1592_v58  ;;  %1432 = vmatprep.subr.bf16.mxu1 %v1608_v2  ;;  %v854_v58 = vld [vmem:[#allocation2 + $0x40] sm:$0xff] }
 0x1d7   : > { %1402 = vmatprep.subr.bf16.mxu0 %v1593_v60 }
 0x1d9   : > { %1433 = vmatpush3.bf16.msra.mxu1 %v1608_v2 }
 0x1da   : > { %1403 = vmatpush3.bf16.msra.mxu0 %v1593_v60  ;;  %1434 = vmatprep.subr.bf16.mxu1 %v1609_v8  ;;  %v857_v60 = vld [vmem:[#allocation2 + $0x58] sm:$0xff] }
 0x1dd   : > { %1405 = vmatmul.mubr.bf16.vlgmr.msra.gmra.mrb[0].mxu0 %v1595_v63  ;;  %1435 = vmatpush3.bf16.msra.mxu1 %v1609_v8  ;;  %v855_v63 = vld [vmem:[#allocation2 + $0x48] sm:$0xff]  ;;  %v861_v8 = vld [vmem:[#allocation2 + $0x78] sm:$0xff] }
 0x1de   : > { %1408 = vmatprep.mubr.bf16.mxu0 %v1596_v0 }
 0x1e5   : > { %1409 = vmatmul.mubr.bf16.gmra.mrb[4].mxu0 %v1597_v3 }
 0x1e6   : > { %1412 = vmatprep.mubr.bf16.mxu0 %v1598_v4 }
 0x1ed   : > { %1413 = vmatmul.mubr.bf16.gmra.mrb[8].mxu0 %v1599_v5  ;;  %v860_v5 = vld [vmem:[#allocation2 + $0x70] sm:$0xff] }
 0x1ee   : > { %1416 = vmatprep.mubr.bf16.mxu0 %v1600_v6  ;;  %v858_v6 = vld [vmem:[#allocation2 + $0x60] sm:$0xff] }
 0x1f5   : > { %1417 = vmatmul.mubr.bf16.gmra.mrb[12].mxu0 %v1601_v7 }
 0x2b0   : > { %v1406_v9 = vpop.f32.mrb[0].mxu0 }
 0x2b1   : > { %v783_v10 = vpop.f32.mrb[1].mxu0 }
 0x2b2   : > { %v1407_v11 = vpop.f32.mrb[2].mxu0 }
 0x2b3   : > { %v863_v12 = vpack.c.bf16 %v1407_v11, %v1406_v9  ;;  %v786_v13 = vpop.f32.mrb[3].mxu0  ;;  %v859_v11 = vld [vmem:[#allocation2 + $0x68] sm:$0xff] }
 0x2b4   : > { %v862_v14 = vpack.c.bf16 %v786_v13, %v783_v10 }
 0x2b6   : > { %1436 = vmatprep.mubr.bf16.mxu1 %v862_v14 }
 0x2b7   : > { %1437 = vmatmul.mubr.bf16.vlgmr.msra.gmra.mrb[0].mxu1 %v863_v12 }
 0x2b8   : > { %v1410_v15 = vpop.f32.mrb[4].mxu0 }
 0x2b9   : > { %v799_v16 = vpop.f32.mrb[5].mxu0 }
 0x2ba   : > { %v1411_v17 = vpop.f32.mrb[6].mxu0 }
 0x2bb   : > { %v865_v18 = vpack.c.bf16 %v1411_v17, %v1410_v15  ;;  %v802_v19 = vpop.f32.mrb[7].mxu0 }
 0x2bc   : > { %v864_v20 = vpack.c.bf16 %v802_v19, %v799_v16 }
 0x2be   : > { %1440 = vmatprep.mubr.bf16.mxu1 %v864_v20 }
 0x2bf   : > { %1441 = vmatmul.mubr.bf16.gmra.mrb[4].mxu1 %v865_v18 }
 0x2c0   : > { %v1414_v21 = vpop.f32.mrb[8].mxu0 }
 0x2c1   : > { %v815_v22 = vpop.f32.mrb[9].mxu0 }
 0x2c2   : > { %v1415_v23 = vpop.f32.mrb[10].mxu0 }
 0x2c3   : > { %v867_v24 = vpack.c.bf16 %v1415_v23, %v1414_v21  ;;  %v818_v25 = vpop.f32.mrb[11].mxu0 }
 0x2c4   : > { %v866_v26 = vpack.c.bf16 %v818_v25, %v815_v22 }
 0x2c6   : > { %1444 = vmatprep.mubr.bf16.mxu1 %v866_v26 }
 0x2c7   : > { %1445 = vmatmul.mubr.bf16.gmra.mrb[8].mxu1 %v867_v24 }
 0x2c8   : > { %v1418_v27 = vpop.f32.mrb[12].mxu0 }
 0x2c9   : > { %v831_v28 = vpop.f32.mrb[13].mxu0 }
 0x2ca   : > { %v1419_v29 = vpop.f32.mrb[14].mxu0 }
 0x2cb   : > { %v869_v30 = vpack.c.bf16 %v1419_v29, %v1418_v27  ;;  %v834_v31 = vpop.f32.mrb[15].mxu0 }
 0x2cc   : > { %v868_v32 = vpack.c.bf16 %v834_v31, %v831_v28 }
 0x2ce   : > { %1448 = vmatprep.mubr.bf16.mxu1 %v868_v32 }
 0x2cf   : > { %1449 = vmatmul.mubr.bf16.gmra.mrb[12].mxu1 %v869_v30 }
 0x38a   : > { %v1438_v35 = vpop.f32.mrb[0].mxu1 }
 0x38b   : > { %v1033_v37 = vadd.f32 %v1438_v35, %v848_v33  ;;  %v968_v38 = vpop.f32.mrb[1].mxu1 }
 0x38c   : > { %v1031_v40 = vadd.f32 %v968_v38, %v846_v34  ;;  %v1439_v41 = vpop.f32.mrb[2].mxu1 }
 0x38d   : > { %1049 = vst [vmem:[#allocation2 + $0x10] sm:$0xff] %v1033_v37  ;;  %v1034_v42 = vadd.f32 %v1439_v41, %v849_v36  ;;  %v971_v43 = vpop.f32.mrb[3].mxu1 }
 0x38e   : > { %1047 = vst [vmem:[#allocation2] sm:$0xff] %v1031_v40  ;;  %v1032_v44 = vadd.f32 %v971_v43, %v847_v39 }
 0x38f   : > { %1050 = vst [vmem:[#allocation2 + $0x18] sm:$0xff] %v1034_v42 }
 0x390   : > { %1048 = vst [vmem:[#allocation2 + $0x8] sm:$0xff] %v1032_v44 }
 0x392   : > { %v1442_v47 = vpop.f32.mrb[4].mxu1 }
 0x393   : > { %v1037_v49 = vadd.f32 %v1442_v47, %v852_v45  ;;  %v984_v50 = vpop.f32.mrb[5].mxu1 }
 0x394   : > { %v1035_v52 = vadd.f32 %v984_v50, %v850_v46  ;;  %v1443_v53 = vpop.f32.mrb[6].mxu1  ;;  %v1069_v19 = vld [vmem:[#allocation2 + $0x10] sm:$0xff] (!%p1301_p11) }
 0x395   : > { %1053 = vst [vmem:[#allocation2 + $0x30] sm:$0xff] %v1037_v49  ;;  %v1038_v54 = vadd.f32 %v1443_v53, %v853_v48  ;;  %v987_v55 = vpop.f32.mrb[7].mxu1  ;;  %v1067_v17 = vld [vmem:[#allocation2] sm:$0xff] (!%p1301_p11)  ;;  %v1085_v22 = vmax.f32 (!%p1301_p11), %v1069_v19, 0.0 }
 0x396   : > { %1051 = vst [vmem:[#allocation2 + $0x20] sm:$0xff] %v1035_v52  ;;  %v1036_v56 = vadd.f32 %v987_v55, %v851_v51  ;;  %v1083_v20 = vmax.f32 (!%p1301_p11), %v1067_v17, 0.0  ;;  %v1070_v23 = vld [vmem:[#allocation2 + $0x18] sm:$0xff] (!%p1301_p11) }
 0x397   : > { %1054 = vst [vmem:[#allocation2 + $0x38] sm:$0xff] %v1038_v54  ;;  %v1068_v18 = vld [vmem:[#allocation2 + $0x8] sm:$0xff] (!%p1301_p11)  ;;  %v1086_v26 = vmax.f32 (!%p1301_p11), %v1070_v23, 0.0  ;;  %1101 = vst [vmem:[#allocation11 + $0x10] sm:$0xff] (!%p1301_p11), %v1085_v22 }
 0x398   : > { %1052 = vst [vmem:[#allocation2 + $0x28] sm:$0xff] %v1036_v56  ;;  %v1084_v21 = vmax.f32 (!%p1301_p11), %v1068_v18, 0.0  ;;  %1099 = vst [vmem:[#allocation11] sm:$0xff] (!%p1301_p11), %v1083_v20 }
 0x399   : > { %1102 = vst [vmem:[#allocation11 + $0x18] sm:$0xff] (!%p1301_p11), %v1086_v26 }
 0x39a   : > { %v1446_v59 = vpop.f32.mrb[8].mxu1  ;;  %1100 = vst [vmem:[#allocation11 + $0x8] sm:$0xff] (!%p1301_p11), %v1084_v21 }
 0x39b   : > { %v1041_v61 = vadd.f32 %v1446_v59, %v856_v57  ;;  %v1000_v62 = vpop.f32.mrb[9].mxu1 }
 0x39c   : > { %v1039_v0 = vadd.f32 %v1000_v62, %v854_v58  ;;  %v1447_v1 = vpop.f32.mrb[10].mxu1  ;;  %v1073_v29 = vld [vmem:[#allocation2 + $0x30] sm:$0xff] (!%p1301_p11) }
 0x39d   : > { %1057 = vst [vmem:[#allocation2 + $0x50] sm:$0xff] %v1041_v61  ;;  %v1042_v2 = vadd.f32 %v1447_v1, %v857_v60  ;;  %v1003_v3 = vpop.f32.mrb[11].mxu1  ;;  %v1071_v24 = vld [vmem:[#allocation2 + $0x20] sm:$0xff] (!%p1301_p11)  ;;  %v1089_v32 = vmax.f32 (!%p1301_p11), %v1073_v29, 0.0 }
 0x39e   : > { %1055 = vst [vmem:[#allocation2 + $0x40] sm:$0xff] %v1039_v0  ;;  %v1040_v4 = vadd.f32 %v1003_v3, %v855_v63  ;;  %v1087_v27 = vmax.f32 (!%p1301_p11), %v1071_v24, 0.0  ;;  %v1074_v30 = vld [vmem:[#allocation2 + $0x38] sm:$0xff] (!%p1301_p11) }
 0x39f   : > { %1058 = vst [vmem:[#allocation2 + $0x58] sm:$0xff] %v1042_v2  ;;  %v1072_v25 = vld [vmem:[#allocation2 + $0x28] sm:$0xff] (!%p1301_p11)  ;;  %v1090_v33 = vmax.f32 (!%p1301_p11), %v1074_v30, 0.0  ;;  %1105 = vst [vmem:[#allocation11 + $0x30] sm:$0xff] (!%p1301_p11), %v1089_v32 }
 0x3a0   : > { %1056 = vst [vmem:[#allocation2 + $0x48] sm:$0xff] %v1040_v4  ;;  %v1088_v28 = vmax.f32 (!%p1301_p11), %v1072_v25, 0.0  ;;  %1103 = vst [vmem:[#allocation11 + $0x20] sm:$0xff] (!%p1301_p11), %v1087_v27 }
 0x3a1   : > { %1106 = vst [vmem:[#allocation11 + $0x38] sm:$0xff] (!%p1301_p11), %v1090_v33 }
 0x3a2   : > { %v1450_v7 = vpop.f32.mrb[12].mxu1  ;;  %1066 = sbr.rel (%p1301_p11) target bundleno = 947 (0x3b3), region = 72  ;;  %1104 = vst [vmem:[#allocation11 + $0x28] sm:$0xff] (!%p1301_p11), %v1088_v28 }
 0x3a3   : > { %v1045_v9 = vadd.f32 %v1450_v7, %v860_v5  ;;  %v1016_v10 = vpop.f32.mrb[13].mxu1 }
 0x3a4   : > { %v1043_v12 = vadd.f32 %v1016_v10, %v858_v6  ;;  %v1451_v13 = vpop.f32.mrb[14].mxu1  ;;  %v1077_v36 = vld [vmem:[#allocation2 + $0x50] sm:$0xff] (!%p1301_p11) }
 0x3a5   : > { %1061 = vst [vmem:[#allocation2 + $0x70] sm:$0xff] %v1045_v9  ;;  %v1046_v14 = vadd.f32 %v1451_v13, %v861_v8  ;;  %v1019_v15 = vpop.f32.mrb[15].mxu1  ;;  %v1075_v31 = vld [vmem:[#allocation2 + $0x40] sm:$0xff] (!%p1301_p11)  ;;  %v1093_v39 = vmax.f32 (!%p1301_p11), %v1077_v36, 0.0 }
 0x3a6   : > { %1059 = vst [vmem:[#allocation2 + $0x60] sm:$0xff] %v1043_v12  ;;  %v1044_v16 = vadd.f32 %v1019_v15, %v859_v11  ;;  %v1091_v34 = vmax.f32 (!%p1301_p11), %v1075_v31, 0.0  ;;  %v1078_v37 = vld [vmem:[#allocation2 + $0x58] sm:$0xff] (!%p1301_p11) }
 0x3a7   : > { %1062 = vst [vmem:[#allocation2 + $0x78] sm:$0xff] %v1046_v14  ;;  %v1076_v35 = vld [vmem:[#allocation2 + $0x48] sm:$0xff] (!%p1301_p11)  ;;  %v1094_v40 = vmax.f32 (!%p1301_p11), %v1078_v37, 0.0  ;;  %1109 = vst [vmem:[#allocation11 + $0x50] sm:$0xff] (!%p1301_p11), %v1093_v39 }
 0x3a8   : > { %1060 = vst [vmem:[#allocation2 + $0x68] sm:$0xff] %v1044_v16  ;;  %v1092_v38 = vmax.f32 (!%p1301_p11), %v1076_v35, 0.0  ;;  %1107 = vst [vmem:[#allocation11 + $0x40] sm:$0xff] (!%p1301_p11), %v1091_v34 }
 0x3a9   : > { %1110 = vst [vmem:[#allocation11 + $0x58] sm:$0xff] %v1094_v40 }
 0x3aa   : > { %1108 = vst [vmem:[#allocation11 + $0x48] sm:$0xff] %v1092_v38 }
 0x3ac   : > { %v1081_v43 = vld [vmem:[#allocation2 + $0x70] sm:$0xff] }
 0x3ad   : > { %v1079_v41 = vld [vmem:[#allocation2 + $0x60] sm:$0xff]  ;;  %v1097_v46 = vmax.f32 %v1081_v43, 0.0 }
 0x3ae   : > { %v1095_v44 = vmax.f32 %v1079_v41, 0.0  ;;  %v1082_v47 = vld [vmem:[#allocation2 + $0x78] sm:$0xff] }
 0x3af   : > { %v1080_v42 = vld [vmem:[#allocation2 + $0x68] sm:$0xff]  ;;  %v1098_v48 = vmax.f32 %v1082_v47, 0.0  ;;  %1113 = vst [vmem:[#allocation11 + $0x70] sm:$0xff] %v1097_v46 }
 0x3b0   : > { %v1096_v45 = vmax.f32 %v1080_v42, 0.0  ;;  %1111 = vst [vmem:[#allocation11 + $0x60] sm:$0xff] %v1095_v44 }
 0x3b1   : > { %1114 = vst [vmem:[#allocation11 + $0x78] sm:$0xff] %v1098_v48 }
 0x3b2   : > { %1112 = vst [vmem:[#allocation11 + $0x68] sm:$0xff] %v1096_v45 }
 0x3b3 PF: > { %p1512_p7 = scmp.eq.s32.totalorder %s1922_s27, 3  ;;  %s1855_s0 = smov [#allocation11]  }
 0x3b4   : > { %s1124_s1 = sshll.u32 %s1855_s0, 4  ;;  %s1125_s1 = int_to_ptr.vmem [resolvable:$true] %s1124_s1 }
 0x3b5   : > { %s1754_s5 = scalar_lea.vmem %s1125_s1, 2048  ;;  %p1761_p4 = scmp.lt.s32.totalorder %s1125_s1, %s1125_s1 }
 0x3b6   : > { %p1755_p0 = scmp.ne.s32.totalorder %s1125_s1, %s1754_s5  ;;  %p1762_p2 = scmp.lt.s32.totalorder %s1754_s5, %s1754_s5 }
 0x3b8   : > { %p1756_p10 = pnand %p1755_p0, %p1512_p7  ;;  %p1763_p5 = por %p1762_p2, %p1761_p4 }
 0x3ba   : > { %p1757_p6 = pneg %p1756_p10 }
 0x3bc   : > { %p1764_p9 = pnand %p1763_p5, %p1757_p6 }
 0x3be   : > { %1767 = shalt.err (!%p1764_p9)
}
 0x3bf   : > { %s2281_s9 = sld [smem:[#allocation24_spill]] }
 0x3c5   : > { %s1768_s18 = scalar_lea.hbm %s2281_s9, 2048 }
 0x3c6   : > { %p1769_p13 = scmp.ne.s32.totalorder %s2281_s9, %s1768_s18  ;;  %p1774_p3 = scmp.lt.u32.totalorder %s1768_s18, %s2281_s9 }
 0x3c8   : > { %p1770_p12 = pnand %p1769_p13, %p1512_p7 }
 0x3ca   : > { %p1771_p1 = pneg %p1770_p12 }
 0x3cc   : > { %p1776_p8 = pnand %p1774_p3, %p1771_p1 }
 0x3ce   : > { %1779 = shalt.err (!%p1776_p8)
}
 0x3cf   : > { %s1856_s19 = smov 128   ;;  %s1857_s8 = smov 8  }
 0x3d0   : > { %1485 = dma.vmem_to_hbm [thread:$0]  (%p1512_p7), %s1125_s1, 2048, %s2281_s9, [#allocation5], %s1856_s19, %s1856_s19, %s1857_s8  }
 0x3d1   : > { %1821 = dma.done.wait (%p1512_p7), [#allocation5], 2048  }
 0x3d2   : > { %1823 = vsyncadd (%p1512_p7), [#allocation5], 4294965248 }
 0x3d3 PF: > { %s2282_s26 = sld [smem:[#allocation18_spill]]  ;;  %s2283_s30 = sld [smem:[#allocation19_spill]] }
 0x3d4   : > { %s2284_s21 = smov %s1830_s22  ;;  %s2285_s22 = smov %s1834_s23 }
 0x3d5   : > { %s2286_s23 = smov %s2077_s14  ;;  %s2287_s24 = smov %s1842_s25 }
 0x3d9   : > { %s19_s26 = sadd.s32 1, %s2282_s26   ;;  %s2288_s25 = smov %s2283_s30 }
 0x3da   : > { %p16_p11 = scmp.ge.s32.totalorder %s19_s26, 6  }
 0x3dc   :  { %18 = sbr.rel (!%p16_p11) target bundleno = 11 (0xb), region = 113 }
 0x3e3   :  { %1140 = vsyncpa [#allocation4], 1 }
 0x3e4   :  { %1142 = vsyncpa [#allocation4 + $0x1], 1 }
 0x3e5   :  { %1143 = vsyncpa [#allocation7], 1 }
 0x3e6   :  { %1144 = vsyncpa [#allocation5], 1 }
 0x3e7   :  { %1146 = vsyncpa [#allocation5 + $0x1], 1 }

</bundles_post_ra>
